<compile_context>
chip_gen: v5e
topology: v5e:2x2
jax: 0.10.0
libtpu: 0.0.40
codegen_flags: <defaults>
</compile_context>

<pallas_src>
import jax
import jax.numpy as jnp
from jax import lax
from jax.experimental import pallas as pl
from jax.experimental.pallas import tpu as pltpu

LN_EPS = 1e-5  # torch.nn.LayerNorm default


def _embedding_kernel(tok_ids_smem,   # (B, S) int32 token ids, SMEM (scalar prefetch)
                      seg_ids_ref,    # (TS, 1) int32 segment ids, VMEM
                      pos_tab_ref,    # (TS, D) positional rows for this tile
                      seg_tab_ref,    # (G, D) segment table (tiny, resident)
                      gamma_ref,      # (1, D)
                      beta_ref,       # (1, D)
                      tok_hbm_ref,    # (V, D) token table, raw HBM ref (pl.ANY)
                      out_ref,        # (TS, D)
                      tok_rows,       # VMEM scratch (TS, D), table dtype
                      sems):          # DMA semaphores, shape (TS,)
    ts = tok_rows.shape[0]
    b = pl.program_id(0)
    s_base = pl.program_id(1) * ts

    # --- token embedding: DMA-gather only the TS needed rows from HBM -------
    # (All scalar SMEM reads happen before any .wait() — keeps sst->sld fwd.)
    copies = []
    for r in range(ts):
        tid = tok_ids_smem[b, s_base + r]
        cp = pltpu.make_async_copy(tok_hbm_ref.at[pl.ds(tid, 1), :],
                                   tok_rows.at[pl.ds(r, 1), :],
                                   sems.at[r])
        cp.start()
        copies.append(cp)
    for cp in copies:
        cp.wait()

    emb = tok_rows[...].astype(jnp.float32)

    # --- positional embedding: rows [s_base, s_base + ts) of pos_table ------
    emb = emb + pos_tab_ref[...].astype(jnp.float32)

    # --- segment embedding: cheap VPU select over the tiny segment table ----
    seg_ids = seg_ids_ref[...]                         # (TS, 1) int32
    seg_tab = seg_tab_ref[...].astype(jnp.float32)     # (G, D)
    seg_emb = jnp.zeros_like(emb)
    for g in range(seg_tab_ref.shape[0]):              # G is small & static
        seg_emb = jnp.where(seg_ids == g, seg_tab[g:g + 1, :], seg_emb)
    emb = emb + seg_emb

    # --- LayerNorm over d_model (f32 statistics) -----------------------------
    mean = jnp.mean(emb, axis=-1, keepdims=True)
    centered = emb - mean
    var = jnp.mean(centered * centered, axis=-1, keepdims=True)
    normed = centered * lax.rsqrt(var + LN_EPS)
    out_ref[...] = (normed * gamma_ref[...] + beta_ref[...]).astype(out_ref.dtype)


def _pick_row_tile(seq_len, max_rows=512):
    """Largest divisor of seq_len that is a multiple of 8 (or seq_len itself)."""
    for t in range(min(seq_len, max_rows), 0, -1):
        if seq_len % t == 0 and (t % 8 == 0 or t == seq_len):
            return t
    return seq_len


def bert_embedding(x, seg, tok_table, pos_table, seg_table, gamma, beta):
    """x, seg: [B, S] integer ids. Returns [B, S, D] float32."""
    B, S = x.shape
    V, D = tok_table.shape
    L, _ = pos_table.shape
    G, _ = seg_table.shape
    assert S <= L, "sequence length must not exceed maxlen"

    ts = _pick_row_tile(S)          # rows per grid step (multiple of 8 or == S)
    grid = (B, S // ts)

    tok_ids = x.astype(jnp.int32)                       # -> SMEM scalar prefetch
    seg3 = seg.astype(jnp.int32).reshape(B, S, 1)       # -> (TS, 1) VMEM blocks
    gamma2 = gamma.reshape(1, D)
    beta2 = beta.reshape(1, D)

    out = pl.pallas_call(
        _embedding_kernel,
        out_shape=jax.ShapeDtypeStruct((B, S, D), jnp.float32),
        grid_spec=pltpu.PrefetchScalarGridSpec(
            num_scalar_prefetch=1,
            grid=grid,
            in_specs=[
                # segment ids: per-(batch, row-tile) block, leading dim squeezed
                pl.BlockSpec((None, ts, 1), lambda b, s, tok: (b, s, 0)),
                # positional rows for this tile (pos == row index in sequence)
                pl.BlockSpec((ts, D), lambda b, s, tok: (s, 0)),
                # tiny segment table, resident
                pl.BlockSpec((G, D), lambda b, s, tok: (0, 0)),
                # LayerNorm affine params, resident
                pl.BlockSpec((1, D), lambda b, s, tok: (0, 0)),
                pl.BlockSpec((1, D), lambda b, s, tok: (0, 0)),
                # token table stays in HBM; kernel gathers rows via DMA
                pl.BlockSpec(memory_space=pl.ANY),
            ],
            out_specs=pl.BlockSpec((None, ts, D), lambda b, s, tok: (b, s, 0)),
            scratch_shapes=[
                pltpu.VMEM((ts, D), tok_table.dtype),   # gathered token rows
                pltpu.SemaphoreType.DMA((ts,)),         # one sem per row DMA
            ],
        ),
        compiler_params=pltpu.CompilerParams(
            dimension_semantics=("parallel", "parallel")),
    )(tok_ids, seg3, pos_table, seg_table, gamma2, beta2, tok_table)
    return out


if __name__ == "__main__":
    # Small shapes consistent with the BERT tutorial module.
    # D is a multiple of 128 (like real BERT's 768) so output stores are
    # lane-dense / unmasked.
    B, S, D = 2, 8, 128
    vocab_size, maxlen, n_segments = 29, 16, 2

    key = jax.random.PRNGKey(0)
    k_tok, k_pos, k_seg, k_x, k_s, k_g, k_b = jax.random.split(key, 7)

    tok_table = jax.random.normal(k_tok, (vocab_size, D), dtype=jnp.float32) * 0.02
    pos_table = jax.random.normal(k_pos, (maxlen, D), dtype=jnp.float32) * 0.02
    seg_table = jax.random.normal(k_seg, (n_segments, D), dtype=jnp.float32) * 0.02
    gamma = 1.0 + 0.1 * jax.random.normal(k_g, (D,), dtype=jnp.float32)
    beta = 0.1 * jax.random.normal(k_b, (D,), dtype=jnp.float32)

    x = jax.random.randint(k_x, (B, S), 0, vocab_size, dtype=jnp.int32)
    seg = jax.random.randint(k_s, (B, S), 0, n_segments, dtype=jnp.int32)

    out = bert_embedding(x, seg, tok_table, pos_table, seg_table, gamma, beta)
    out = jax.block_until_ready(out)

    # Reference check in plain JAX (same math as the PyTorch forward).
    pos = jnp.broadcast_to(jnp.arange(S, dtype=jnp.int32)[None, :], (B, S))
    emb_ref = tok_table[x] + pos_table[pos] + seg_table[seg]
    mean = emb_ref.mean(-1, keepdims=True)
    var = ((emb_ref - mean) ** 2).mean(-1, keepdims=True)
    ref = (emb_ref - mean) / jnp.sqrt(var + LN_EPS) * gamma + beta

    assert out.shape == (B, S, D)
    assert jnp.allclose(out, ref, atol=1e-4, rtol=1e-4)
    print("KERNEL_OK")
</pallas_src>

<mosaic_0001>
module attributes {stable_mosaic.version = 11 : i64} {
  func.func @_embedding_kernel(%arg0: i32, %arg1: i32, %arg2: memref<2x8xi32, #tpu.memory_space<smem>>, %arg3: memref<1x8x1xi32, #tpu.memory_space<vmem>>, %arg4: memref<8x128xf32, #tpu.memory_space<vmem>>, %arg5: memref<2x128xf32, #tpu.memory_space<vmem>>, %arg6: memref<1x128xf32, #tpu.memory_space<vmem>>, %arg7: memref<1x128xf32, #tpu.memory_space<vmem>>, %arg8: memref<29x128xf32, #tpu.memory_space<any>>, %arg9: memref<1x8x128xf32, #tpu.memory_space<vmem>>, %arg10: memref<8x128xf32, #tpu.memory_space<vmem>>, %arg11: memref<8x!tpu.dma_semaphore, #tpu.memory_space<semaphore_mem>>) attributes {dimension_semantics = [#tpu.dimension_semantics<parallel>, #tpu.dimension_semantics<parallel>], iteration_bounds = array<i64: 2, 1>, scalar_prefetch = 1 : i64, scratch_operands = 2 : i64, tpu.core_type = #tpu.core_type<tc>, window_params = [{transform_indices = @transform_0, window_bounds = array<i64: 1, 8, 1>}, {transform_indices = @transform_1, window_bounds = array<i64: 8, 128>}, {pipeline_mode = #tpu.pipeline_mode<synchronous>, transform_indices = @transform_2, window_bounds = array<i64: 2, 128>}, {pipeline_mode = #tpu.pipeline_mode<synchronous>, transform_indices = @transform_3, window_bounds = array<i64: 1, 128>}, {pipeline_mode = #tpu.pipeline_mode<synchronous>, transform_indices = @transform_4, window_bounds = array<i64: 1, 128>}, {}, {transform_indices = @transform_6, window_bounds = array<i64: 1, 8, 128>}]} {
    %c8_i32 = arith.constant 8 : i32
    %0 = arith.muli %arg1, %c8_i32 : i32
    %c0_i32 = arith.constant 0 : i32
    %1 = arith.addi %0, %c0_i32 : i32
    %2 = arith.index_cast %arg0 : i32 to index
    %3 = arith.index_cast %1 : i32 to index
    %4 = memref.load %arg2[%2, %3] : memref<2x8xi32, #tpu.memory_space<smem>>
    %c0_i32_0 = arith.constant 0 : i32
    %c0_i32_1 = arith.constant 0 : i32
    %5 = tpu.memref_slice %arg8[%4, %c0_i32_1] : memref<29x128xf32, #tpu.memory_space<any>> -> memref<1x128xf32, #tpu.memory_space<any>>
    %c0_i32_2 = arith.constant 0 : i32
    %c0_i32_3 = arith.constant 0 : i32
    %6 = tpu.memref_slice %arg10[%c0_i32_2, %c0_i32_3] : memref<8x128xf32, #tpu.memory_space<vmem>> -> memref<1x128xf32, #tpu.memory_space<vmem>>
    %7 = tpu.memref_slice %arg11[%c0_i32_0] : memref<8x!tpu.dma_semaphore, #tpu.memory_space<semaphore_mem>> -> memref<1x!tpu.dma_semaphore, #tpu.memory_space<semaphore_mem>>
    %8 = tpu.memref_squeeze %7 : memref<1x!tpu.dma_semaphore, #tpu.memory_space<semaphore_mem>> -> memref<!tpu.dma_semaphore, #tpu.memory_space<semaphore_mem>>
    tpu.enqueue_dma source(%5 : memref<1x128xf32, #tpu.memory_space<any>>) target(%6 : memref<1x128xf32, #tpu.memory_space<vmem>>) target_semaphore(%8 : memref<!tpu.dma_semaphore, #tpu.memory_space<semaphore_mem>>)
    %c1_i32 = arith.constant 1 : i32
    %9 = arith.addi %0, %c1_i32 : i32
    %10 = arith.index_cast %arg0 : i32 to index
    %11 = arith.index_cast %9 : i32 to index
    %12 = memref.load %arg2[%10, %11] : memref<2x8xi32, #tpu.memory_space<smem>>
    %c1_i32_4 = arith.constant 1 : i32
    %c0_i32_5 = arith.constant 0 : i32
    %13 = tpu.memref_slice %arg8[%12, %c0_i32_5] : memref<29x128xf32, #tpu.memory_space<any>> -> memref<1x128xf32, #tpu.memory_space<any>>
    %c1_i32_6 = arith.constant 1 : i32
    %c0_i32_7 = arith.constant 0 : i32
    %14 = tpu.memref_slice %arg10[%c1_i32_6, %c0_i32_7] : memref<8x128xf32, #tpu.memory_space<vmem>> -> memref<1x128xf32, #tpu.memory_space<vmem>>
    %15 = tpu.memref_slice %arg11[%c1_i32_4] : memref<8x!tpu.dma_semaphore, #tpu.memory_space<semaphore_mem>> -> memref<1x!tpu.dma_semaphore, #tpu.memory_space<semaphore_mem>>
    %16 = tpu.memref_squeeze %15 : memref<1x!tpu.dma_semaphore, #tpu.memory_space<semaphore_mem>> -> memref<!tpu.dma_semaphore, #tpu.memory_space<semaphore_mem>>
    tpu.enqueue_dma source(%13 : memref<1x128xf32, #tpu.memory_space<any>>) target(%14 : memref<1x128xf32, #tpu.memory_space<vmem>>) target_semaphore(%16 : memref<!tpu.dma_semaphore, #tpu.memory_space<semaphore_mem>>)
    %c2_i32 = arith.constant 2 : i32
    %17 = arith.addi %0, %c2_i32 : i32
    %18 = arith.index_cast %arg0 : i32 to index
    %19 = arith.index_cast %17 : i32 to index
    %20 = memref.load %arg2[%18, %19] : memref<2x8xi32, #tpu.memory_space<smem>>
    %c2_i32_8 = arith.constant 2 : i32
    %c0_i32_9 = arith.constant 0 : i32
    %21 = tpu.memref_slice %arg8[%20, %c0_i32_9] : memref<29x128xf32, #tpu.memory_space<any>> -> memref<1x128xf32, #tpu.memory_space<any>>
    %c2_i32_10 = arith.constant 2 : i32
    %c0_i32_11 = arith.constant 0 : i32
    %22 = tpu.memref_slice %arg10[%c2_i32_10, %c0_i32_11] : memref<8x128xf32, #tpu.memory_space<vmem>> -> memref<1x128xf32, #tpu.memory_space<vmem>>
    %23 = tpu.memref_slice %arg11[%c2_i32_8] : memref<8x!tpu.dma_semaphore, #tpu.memory_space<semaphore_mem>> -> memref<1x!tpu.dma_semaphore, #tpu.memory_space<semaphore_mem>>
    %24 = tpu.memref_squeeze %23 : memref<1x!tpu.dma_semaphore, #tpu.memory_space<semaphore_mem>> -> memref<!tpu.dma_semaphore, #tpu.memory_space<semaphore_mem>>
    tpu.enqueue_dma source(%21 : memref<1x128xf32, #tpu.memory_space<any>>) target(%22 : memref<1x128xf32, #tpu.memory_space<vmem>>) target_semaphore(%24 : memref<!tpu.dma_semaphore, #tpu.memory_space<semaphore_mem>>)
    %c3_i32 = arith.constant 3 : i32
    %25 = arith.addi %0, %c3_i32 : i32
    %26 = arith.index_cast %arg0 : i32 to index
    %27 = arith.index_cast %25 : i32 to index
    %28 = memref.load %arg2[%26, %27] : memref<2x8xi32, #tpu.memory_space<smem>>
    %c3_i32_12 = arith.constant 3 : i32
    %c0_i32_13 = arith.constant 0 : i32
    %29 = tpu.memref_slice %arg8[%28, %c0_i32_13] : memref<29x128xf32, #tpu.memory_space<any>> -> memref<1x128xf32, #tpu.memory_space<any>>
    %c3_i32_14 = arith.constant 3 : i32
    %c0_i32_15 = arith.constant 0 : i32
    %30 = tpu.memref_slice %arg10[%c3_i32_14, %c0_i32_15] : memref<8x128xf32, #tpu.memory_space<vmem>> -> memref<1x128xf32, #tpu.memory_space<vmem>>
    %31 = tpu.memref_slice %arg11[%c3_i32_12] : memref<8x!tpu.dma_semaphore, #tpu.memory_space<semaphore_mem>> -> memref<1x!tpu.dma_semaphore, #tpu.memory_space<semaphore_mem>>
    %32 = tpu.memref_squeeze %31 : memref<1x!tpu.dma_semaphore, #tpu.memory_space<semaphore_mem>> -> memref<!tpu.dma_semaphore, #tpu.memory_space<semaphore_mem>>
    tpu.enqueue_dma source(%29 : memref<1x128xf32, #tpu.memory_space<any>>) target(%30 : memref<1x128xf32, #tpu.memory_space<vmem>>) target_semaphore(%32 : memref<!tpu.dma_semaphore, #tpu.memory_space<semaphore_mem>>)
    %c4_i32 = arith.constant 4 : i32
    %33 = arith.addi %0, %c4_i32 : i32
    %34 = arith.index_cast %arg0 : i32 to index
    %35 = arith.index_cast %33 : i32 to index
    %36 = memref.load %arg2[%34, %35] : memref<2x8xi32, #tpu.memory_space<smem>>
    %c4_i32_16 = arith.constant 4 : i32
    %c0_i32_17 = arith.constant 0 : i32
    %37 = tpu.memref_slice %arg8[%36, %c0_i32_17] : memref<29x128xf32, #tpu.memory_space<any>> -> memref<1x128xf32, #tpu.memory_space<any>>
    %c4_i32_18 = arith.constant 4 : i32
    %c0_i32_19 = arith.constant 0 : i32
    %38 = tpu.memref_slice %arg10[%c4_i32_18, %c0_i32_19] : memref<8x128xf32, #tpu.memory_space<vmem>> -> memref<1x128xf32, #tpu.memory_space<vmem>>
    %39 = tpu.memref_slice %arg11[%c4_i32_16] : memref<8x!tpu.dma_semaphore, #tpu.memory_space<semaphore_mem>> -> memref<1x!tpu.dma_semaphore, #tpu.memory_space<semaphore_mem>>
    %40 = tpu.memref_squeeze %39 : memref<1x!tpu.dma_semaphore, #tpu.memory_space<semaphore_mem>> -> memref<!tpu.dma_semaphore, #tpu.memory_space<semaphore_mem>>
    tpu.enqueue_dma source(%37 : memref<1x128xf32, #tpu.memory_space<any>>) target(%38 : memref<1x128xf32, #tpu.memory_space<vmem>>) target_semaphore(%40 : memref<!tpu.dma_semaphore, #tpu.memory_space<semaphore_mem>>)
    %c5_i32 = arith.constant 5 : i32
    %41 = arith.addi %0, %c5_i32 : i32
    %42 = arith.index_cast %arg0 : i32 to index
    %43 = arith.index_cast %41 : i32 to index
    %44 = memref.load %arg2[%42, %43] : memref<2x8xi32, #tpu.memory_space<smem>>
    %c5_i32_20 = arith.constant 5 : i32
    %c0_i32_21 = arith.constant 0 : i32
    %45 = tpu.memref_slice %arg8[%44, %c0_i32_21] : memref<29x128xf32, #tpu.memory_space<any>> -> memref<1x128xf32, #tpu.memory_space<any>>
    %c5_i32_22 = arith.constant 5 : i32
    %c0_i32_23 = arith.constant 0 : i32
    %46 = tpu.memref_slice %arg10[%c5_i32_22, %c0_i32_23] : memref<8x128xf32, #tpu.memory_space<vmem>> -> memref<1x128xf32, #tpu.memory_space<vmem>>
    %47 = tpu.memref_slice %arg11[%c5_i32_20] : memref<8x!tpu.dma_semaphore, #tpu.memory_space<semaphore_mem>> -> memref<1x!tpu.dma_semaphore, #tpu.memory_space<semaphore_mem>>
    %48 = tpu.memref_squeeze %47 : memref<1x!tpu.dma_semaphore, #tpu.memory_space<semaphore_mem>> -> memref<!tpu.dma_semaphore, #tpu.memory_space<semaphore_mem>>
    tpu.enqueue_dma source(%45 : memref<1x128xf32, #tpu.memory_space<any>>) target(%46 : memref<1x128xf32, #tpu.memory_space<vmem>>) target_semaphore(%48 : memref<!tpu.dma_semaphore, #tpu.memory_space<semaphore_mem>>)
    %c6_i32 = arith.constant 6 : i32
    %49 = arith.addi %0, %c6_i32 : i32
    %50 = arith.index_cast %arg0 : i32 to index
    %51 = arith.index_cast %49 : i32 to index
    %52 = memref.load %arg2[%50, %51] : memref<2x8xi32, #tpu.memory_space<smem>>
    %c6_i32_24 = arith.constant 6 : i32
    %c0_i32_25 = arith.constant 0 : i32
    %53 = tpu.memref_slice %arg8[%52, %c0_i32_25] : memref<29x128xf32, #tpu.memory_space<any>> -> memref<1x128xf32, #tpu.memory_space<any>>
    %c6_i32_26 = arith.constant 6 : i32
    %c0_i32_27 = arith.constant 0 : i32
    %54 = tpu.memref_slice %arg10[%c6_i32_26, %c0_i32_27] : memref<8x128xf32, #tpu.memory_space<vmem>> -> memref<1x128xf32, #tpu.memory_space<vmem>>
    %55 = tpu.memref_slice %arg11[%c6_i32_24] : memref<8x!tpu.dma_semaphore, #tpu.memory_space<semaphore_mem>> -> memref<1x!tpu.dma_semaphore, #tpu.memory_space<semaphore_mem>>
    %56 = tpu.memref_squeeze %55 : memref<1x!tpu.dma_semaphore, #tpu.memory_space<semaphore_mem>> -> memref<!tpu.dma_semaphore, #tpu.memory_space<semaphore_mem>>
    tpu.enqueue_dma source(%53 : memref<1x128xf32, #tpu.memory_space<any>>) target(%54 : memref<1x128xf32, #tpu.memory_space<vmem>>) target_semaphore(%56 : memref<!tpu.dma_semaphore, #tpu.memory_space<semaphore_mem>>)
    %c7_i32 = arith.constant 7 : i32
    %57 = arith.addi %0, %c7_i32 : i32
    %58 = arith.index_cast %arg0 : i32 to index
    %59 = arith.index_cast %57 : i32 to index
    %60 = memref.load %arg2[%58, %59] : memref<2x8xi32, #tpu.memory_space<smem>>
    %c7_i32_28 = arith.constant 7 : i32
    %c0_i32_29 = arith.constant 0 : i32
    %61 = tpu.memref_slice %arg8[%60, %c0_i32_29] : memref<29x128xf32, #tpu.memory_space<any>> -> memref<1x128xf32, #tpu.memory_space<any>>
    %c7_i32_30 = arith.constant 7 : i32
    %c0_i32_31 = arith.constant 0 : i32
    %62 = tpu.memref_slice %arg10[%c7_i32_30, %c0_i32_31] : memref<8x128xf32, #tpu.memory_space<vmem>> -> memref<1x128xf32, #tpu.memory_space<vmem>>
    %63 = tpu.memref_slice %arg11[%c7_i32_28] : memref<8x!tpu.dma_semaphore, #tpu.memory_space<semaphore_mem>> -> memref<1x!tpu.dma_semaphore, #tpu.memory_space<semaphore_mem>>
    %64 = tpu.memref_squeeze %63 : memref<1x!tpu.dma_semaphore, #tpu.memory_space<semaphore_mem>> -> memref<!tpu.dma_semaphore, #tpu.memory_space<semaphore_mem>>
    tpu.enqueue_dma source(%61 : memref<1x128xf32, #tpu.memory_space<any>>) target(%62 : memref<1x128xf32, #tpu.memory_space<vmem>>) target_semaphore(%64 : memref<!tpu.dma_semaphore, #tpu.memory_space<semaphore_mem>>)
    %c0_i32_32 = arith.constant 0 : i32
    %c0_i32_33 = arith.constant 0 : i32
    %65 = tpu.memref_slice %arg8[%4, %c0_i32_33] : memref<29x128xf32, #tpu.memory_space<any>> -> memref<1x128xf32, #tpu.memory_space<any>>
    %c0_i32_34 = arith.constant 0 : i32
    %c0_i32_35 = arith.constant 0 : i32
    %66 = tpu.memref_slice %arg10[%c0_i32_34, %c0_i32_35] : memref<8x128xf32, #tpu.memory_space<vmem>> -> memref<1x128xf32, #tpu.memory_space<vmem>>
    %67 = tpu.memref_slice %arg11[%c0_i32_32] : memref<8x!tpu.dma_semaphore, #tpu.memory_space<semaphore_mem>> -> memref<1x!tpu.dma_semaphore, #tpu.memory_space<semaphore_mem>>
    %68 = tpu.memref_squeeze %67 : memref<1x!tpu.dma_semaphore, #tpu.memory_space<semaphore_mem>> -> memref<!tpu.dma_semaphore, #tpu.memory_space<semaphore_mem>>
    tpu.wait_dma2 semaphore(%68 : memref<!tpu.dma_semaphore, #tpu.memory_space<semaphore_mem>>) src(%65 : memref<1x128xf32, #tpu.memory_space<any>>) dst(%66 : memref<1x128xf32, #tpu.memory_space<vmem>>)
    %c1_i32_36 = arith.constant 1 : i32
    %c0_i32_37 = arith.constant 0 : i32
    %69 = tpu.memref_slice %arg8[%12, %c0_i32_37] : memref<29x128xf32, #tpu.memory_space<any>> -> memref<1x128xf32, #tpu.memory_space<any>>
    %c1_i32_38 = arith.constant 1 : i32
    %c0_i32_39 = arith.constant 0 : i32
    %70 = tpu.memref_slice %arg10[%c1_i32_38, %c0_i32_39] : memref<8x128xf32, #tpu.memory_space<vmem>> -> memref<1x128xf32, #tpu.memory_space<vmem>>
    %71 = tpu.memref_slice %arg11[%c1_i32_36] : memref<8x!tpu.dma_semaphore, #tpu.memory_space<semaphore_mem>> -> memref<1x!tpu.dma_semaphore, #tpu.memory_space<semaphore_mem>>
    %72 = tpu.memref_squeeze %71 : memref<1x!tpu.dma_semaphore, #tpu.memory_space<semaphore_mem>> -> memref<!tpu.dma_semaphore, #tpu.memory_space<semaphore_mem>>
    tpu.wait_dma2 semaphore(%72 : memref<!tpu.dma_semaphore, #tpu.memory_space<semaphore_mem>>) src(%69 : memref<1x128xf32, #tpu.memory_space<any>>) dst(%70 : memref<1x128xf32, #tpu.memory_space<vmem>>)
    %c2_i32_40 = arith.constant 2 : i32
    %c0_i32_41 = arith.constant 0 : i32
    %73 = tpu.memref_slice %arg8[%20, %c0_i32_41] : memref<29x128xf32, #tpu.memory_space<any>> -> memref<1x128xf32, #tpu.memory_space<any>>
    %c2_i32_42 = arith.constant 2 : i32
    %c0_i32_43 = arith.constant 0 : i32
    %74 = tpu.memref_slice %arg10[%c2_i32_42, %c0_i32_43] : memref<8x128xf32, #tpu.memory_space<vmem>> -> memref<1x128xf32, #tpu.memory_space<vmem>>
    %75 = tpu.memref_slice %arg11[%c2_i32_40] : memref<8x!tpu.dma_semaphore, #tpu.memory_space<semaphore_mem>> -> memref<1x!tpu.dma_semaphore, #tpu.memory_space<semaphore_mem>>
    %76 = tpu.memref_squeeze %75 : memref<1x!tpu.dma_semaphore, #tpu.memory_space<semaphore_mem>> -> memref<!tpu.dma_semaphore, #tpu.memory_space<semaphore_mem>>
    tpu.wait_dma2 semaphore(%76 : memref<!tpu.dma_semaphore, #tpu.memory_space<semaphore_mem>>) src(%73 : memref<1x128xf32, #tpu.memory_space<any>>) dst(%74 : memref<1x128xf32, #tpu.memory_space<vmem>>)
    %c3_i32_44 = arith.constant 3 : i32
    %c0_i32_45 = arith.constant 0 : i32
    %77 = tpu.memref_slice %arg8[%28, %c0_i32_45] : memref<29x128xf32, #tpu.memory_space<any>> -> memref<1x128xf32, #tpu.memory_space<any>>
    %c3_i32_46 = arith.constant 3 : i32
    %c0_i32_47 = arith.constant 0 : i32
    %78 = tpu.memref_slice %arg10[%c3_i32_46, %c0_i32_47] : memref<8x128xf32, #tpu.memory_space<vmem>> -> memref<1x128xf32, #tpu.memory_space<vmem>>
    %79 = tpu.memref_slice %arg11[%c3_i32_44] : memref<8x!tpu.dma_semaphore, #tpu.memory_space<semaphore_mem>> -> memref<1x!tpu.dma_semaphore, #tpu.memory_space<semaphore_mem>>
    %80 = tpu.memref_squeeze %79 : memref<1x!tpu.dma_semaphore, #tpu.memory_space<semaphore_mem>> -> memref<!tpu.dma_semaphore, #tpu.memory_space<semaphore_mem>>
    tpu.wait_dma2 semaphore(%80 : memref<!tpu.dma_semaphore, #tpu.memory_space<semaphore_mem>>) src(%77 : memref<1x128xf32, #tpu.memory_space<any>>) dst(%78 : memref<1x128xf32, #tpu.memory_space<vmem>>)
    %c4_i32_48 = arith.constant 4 : i32
    %c0_i32_49 = arith.constant 0 : i32
    %81 = tpu.memref_slice %arg8[%36, %c0_i32_49] : memref<29x128xf32, #tpu.memory_space<any>> -> memref<1x128xf32, #tpu.memory_space<any>>
    %c4_i32_50 = arith.constant 4 : i32
    %c0_i32_51 = arith.constant 0 : i32
    %82 = tpu.memref_slice %arg10[%c4_i32_50, %c0_i32_51] : memref<8x128xf32, #tpu.memory_space<vmem>> -> memref<1x128xf32, #tpu.memory_space<vmem>>
    %83 = tpu.memref_slice %arg11[%c4_i32_48] : memref<8x!tpu.dma_semaphore, #tpu.memory_space<semaphore_mem>> -> memref<1x!tpu.dma_semaphore, #tpu.memory_space<semaphore_mem>>
    %84 = tpu.memref_squeeze %83 : memref<1x!tpu.dma_semaphore, #tpu.memory_space<semaphore_mem>> -> memref<!tpu.dma_semaphore, #tpu.memory_space<semaphore_mem>>
    tpu.wait_dma2 semaphore(%84 : memref<!tpu.dma_semaphore, #tpu.memory_space<semaphore_mem>>) src(%81 : memref<1x128xf32, #tpu.memory_space<any>>) dst(%82 : memref<1x128xf32, #tpu.memory_space<vmem>>)
    %c5_i32_52 = arith.constant 5 : i32
    %c0_i32_53 = arith.constant 0 : i32
    %85 = tpu.memref_slice %arg8[%44, %c0_i32_53] : memref<29x128xf32, #tpu.memory_space<any>> -> memref<1x128xf32, #tpu.memory_space<any>>
    %c5_i32_54 = arith.constant 5 : i32
    %c0_i32_55 = arith.constant 0 : i32
    %86 = tpu.memref_slice %arg10[%c5_i32_54, %c0_i32_55] : memref<8x128xf32, #tpu.memory_space<vmem>> -> memref<1x128xf32, #tpu.memory_space<vmem>>
    %87 = tpu.memref_slice %arg11[%c5_i32_52] : memref<8x!tpu.dma_semaphore, #tpu.memory_space<semaphore_mem>> -> memref<1x!tpu.dma_semaphore, #tpu.memory_space<semaphore_mem>>
    %88 = tpu.memref_squeeze %87 : memref<1x!tpu.dma_semaphore, #tpu.memory_space<semaphore_mem>> -> memref<!tpu.dma_semaphore, #tpu.memory_space<semaphore_mem>>
    tpu.wait_dma2 semaphore(%88 : memref<!tpu.dma_semaphore, #tpu.memory_space<semaphore_mem>>) src(%85 : memref<1x128xf32, #tpu.memory_space<any>>) dst(%86 : memref<1x128xf32, #tpu.memory_space<vmem>>)
    %c6_i32_56 = arith.constant 6 : i32
    %c0_i32_57 = arith.constant 0 : i32
    %89 = tpu.memref_slice %arg8[%52, %c0_i32_57] : memref<29x128xf32, #tpu.memory_space<any>> -> memref<1x128xf32, #tpu.memory_space<any>>
    %c6_i32_58 = arith.constant 6 : i32
    %c0_i32_59 = arith.constant 0 : i32
    %90 = tpu.memref_slice %arg10[%c6_i32_58, %c0_i32_59] : memref<8x128xf32, #tpu.memory_space<vmem>> -> memref<1x128xf32, #tpu.memory_space<vmem>>
    %91 = tpu.memref_slice %arg11[%c6_i32_56] : memref<8x!tpu.dma_semaphore, #tpu.memory_space<semaphore_mem>> -> memref<1x!tpu.dma_semaphore, #tpu.memory_space<semaphore_mem>>
    %92 = tpu.memref_squeeze %91 : memref<1x!tpu.dma_semaphore, #tpu.memory_space<semaphore_mem>> -> memref<!tpu.dma_semaphore, #tpu.memory_space<semaphore_mem>>
    tpu.wait_dma2 semaphore(%92 : memref<!tpu.dma_semaphore, #tpu.memory_space<semaphore_mem>>) src(%89 : memref<1x128xf32, #tpu.memory_space<any>>) dst(%90 : memref<1x128xf32, #tpu.memory_space<vmem>>)
    %c7_i32_60 = arith.constant 7 : i32
    %c0_i32_61 = arith.constant 0 : i32
    %93 = tpu.memref_slice %arg8[%60, %c0_i32_61] : memref<29x128xf32, #tpu.memory_space<any>> -> memref<1x128xf32, #tpu.memory_space<any>>
    %c7_i32_62 = arith.constant 7 : i32
    %c0_i32_63 = arith.constant 0 : i32
    %94 = tpu.memref_slice %arg10[%c7_i32_62, %c0_i32_63] : memref<8x128xf32, #tpu.memory_space<vmem>> -> memref<1x128xf32, #tpu.memory_space<vmem>>
    %95 = tpu.memref_slice %arg11[%c7_i32_60] : memref<8x!tpu.dma_semaphore, #tpu.memory_space<semaphore_mem>> -> memref<1x!tpu.dma_semaphore, #tpu.memory_space<semaphore_mem>>
    %96 = tpu.memref_squeeze %95 : memref<1x!tpu.dma_semaphore, #tpu.memory_space<semaphore_mem>> -> memref<!tpu.dma_semaphore, #tpu.memory_space<semaphore_mem>>
    tpu.wait_dma2 semaphore(%96 : memref<!tpu.dma_semaphore, #tpu.memory_space<semaphore_mem>>) src(%93 : memref<1x128xf32, #tpu.memory_space<any>>) dst(%94 : memref<1x128xf32, #tpu.memory_space<vmem>>)
    %c0 = arith.constant 0 : index
    %c0_64 = arith.constant 0 : index
    %97 = vector.load %arg10[%c0, %c0_64] : memref<8x128xf32, #tpu.memory_space<vmem>>, vector<8x128xf32>
    %c0_65 = arith.constant 0 : index
    %c0_66 = arith.constant 0 : index
    %98 = vector.load %arg4[%c0_65, %c0_66] : memref<8x128xf32, #tpu.memory_space<vmem>>, vector<8x128xf32>
    %99 = arith.addf %97, %98 : vector<8x128xf32>
    %c0_67 = arith.constant 0 : index
    %c0_68 = arith.constant 0 : index
    %c0_69 = arith.constant 0 : index
    %100 = vector.load %arg3[%c0_67, %c0_68, %c0_69] : memref<1x8x1xi32, #tpu.memory_space<vmem>>, vector<1x8x1xi32>
    %101 = vector.shape_cast %100 : vector<1x8x1xi32> to vector<8x1xi32>
    %c0_70 = arith.constant 0 : index
    %c0_71 = arith.constant 0 : index
    %102 = vector.load %arg5[%c0_70, %c0_71] : memref<2x128xf32, #tpu.memory_space<vmem>>, vector<2x128xf32>
    %cst = arith.constant 0.000000e+00 : f32
    %103 = vector.broadcast %cst : f32 to vector<8x128xf32>
    %c0_i32_72 = arith.constant 0 : i32
    %104 = vector.broadcast %c0_i32_72 : i32 to vector<8x1xi32>
    %105 = arith.cmpi eq, %101, %104 : vector<8x1xi32>
    %106 = vector.extract_strided_slice %102 {offsets = [0, 0], sizes = [1, 128], strides = [1, 1]} : vector<2x128xf32> to vector<1x128xf32>
    %107 = vector.shape_cast %105 : vector<8x1xi1> to vector<8x1xi1>
    %108 = vector.broadcast %107 : vector<8x1xi1> to vector<8x128xi1>
    %109 = vector.shape_cast %106 : vector<1x128xf32> to vector<1x128xf32>
    %110 = vector.broadcast %109 : vector<1x128xf32> to vector<8x128xf32>
    %111 = arith.select %108, %110, %103 : vector<8x128xi1>, vector<8x128xf32>
    %c1_i32_73 = arith.constant 1 : i32
    %112 = vector.broadcast %c1_i32_73 : i32 to vector<8x1xi32>
    %113 = arith.cmpi eq, %101, %112 : vector<8x1xi32>
    %114 = vector.extract_strided_slice %102 {offsets = [1, 0], sizes = [1, 128], strides = [1, 1]} : vector<2x128xf32> to vector<1x128xf32>
    %115 = vector.shape_cast %113 : vector<8x1xi1> to vector<8x1xi1>
    %116 = vector.broadcast %115 : vector<8x1xi1> to vector<8x128xi1>
    %117 = vector.shape_cast %114 : vector<1x128xf32> to vector<1x128xf32>
    %118 = vector.broadcast %117 : vector<1x128xf32> to vector<8x128xf32>
    %119 = arith.select %116, %118, %111 : vector<8x128xi1>, vector<8x128xf32>
    %120 = arith.addf %99, %119 : vector<8x128xf32>
    %cst_74 = arith.constant dense<0.000000e+00> : vector<8xf32>
    %121 = vector.multi_reduction <add>, %120, %cst_74 [1] : vector<8x128xf32> to vector<8xf32>
    %122 = vector.shape_cast %121 : vector<8xf32> to vector<8x1xf32>
    %cst_75 = arith.constant 1.280000e+02 : f32
    %123 = vector.broadcast %cst_75 : f32 to vector<8x1xf32>
    %124 = arith.divf %122, %123 : vector<8x1xf32>
    %125 = vector.broadcast %124 : vector<8x1xf32> to vector<8x128xf32>
    %126 = arith.subf %120, %125 : vector<8x128xf32>
    %127 = arith.mulf %126, %126 : vector<8x128xf32>
    %cst_76 = arith.constant dense<0.000000e+00> : vector<8xf32>
    %128 = vector.multi_reduction <add>, %127, %cst_76 [1] : vector<8x128xf32> to vector<8xf32>
    %129 = vector.shape_cast %128 : vector<8xf32> to vector<8x1xf32>
    %cst_77 = arith.constant 1.280000e+02 : f32
    %130 = vector.broadcast %cst_77 : f32 to vector<8x1xf32>
    %131 = arith.divf %129, %130 : vector<8x1xf32>
    %cst_78 = arith.constant 9.99999974E-6 : f32
    %132 = vector.broadcast %cst_78 : f32 to vector<8x1xf32>
    %133 = arith.addf %131, %132 : vector<8x1xf32>
    %134 = math.rsqrt %133 : vector<8x1xf32>
    %135 = vector.broadcast %134 : vector<8x1xf32> to vector<8x128xf32>
    %136 = arith.mulf %126, %135 : vector<8x128xf32>
    %c0_79 = arith.constant 0 : index
    %c0_80 = arith.constant 0 : index
    %137 = vector.load %arg6[%c0_79, %c0_80] : memref<1x128xf32, #tpu.memory_space<vmem>>, vector<1x128xf32>
    %138 = vector.broadcast %137 : vector<1x128xf32> to vector<8x128xf32>
    %139 = arith.mulf %136, %138 : vector<8x128xf32>
    %c0_81 = arith.constant 0 : index
    %c0_82 = arith.constant 0 : index
    %140 = vector.load %arg7[%c0_81, %c0_82] : memref<1x128xf32, #tpu.memory_space<vmem>>, vector<1x128xf32>
    %141 = vector.broadcast %140 : vector<1x128xf32> to vector<8x128xf32>
    %142 = arith.addf %139, %141 : vector<8x128xf32>
    %c0_83 = arith.constant 0 : index
    %c0_84 = arith.constant 0 : index
    %c0_85 = arith.constant 0 : index
    %143 = vector.load %arg9[%c0_83, %c0_84, %c0_85] : memref<1x8x128xf32, #tpu.memory_space<vmem>>, vector<1x8x128xf32>
    %144 = vector.shape_cast %143 : vector<1x8x128xf32> to vector<8x128xf32>
    %145 = vector.shape_cast %142 : vector<8x128xf32> to vector<1x8x128xf32>
    tpu.vector_store %arg9[%c0_83, %c0_84, %c0_85], %145 {strides = array<i32>} : memref<1x8x128xf32, #tpu.memory_space<vmem>>, vector<1x8x128xf32>,
    return
  }
  func.func @transform_0(%arg0: i32, %arg1: i32, %arg2: memref<2x8xi32, #tpu.memory_space<smem>>) -> (i32, i32, i32) {
    %c0_i32 = arith.constant 0 : i32
    %c0_i32_0 = arith.constant 0 : i32
    return %arg0, %arg1, %c0_i32 : i32, i32, i32
  }
  func.func @transform_1(%arg0: i32, %arg1: i32, %arg2: memref<2x8xi32, #tpu.memory_space<smem>>) -> (i32, i32) {
    %c0_i32 = arith.constant 0 : i32
    %c0_i32_0 = arith.constant 0 : i32
    return %arg1, %c0_i32 : i32, i32
  }
  func.func @transform_2(%arg0: i32, %arg1: i32, %arg2: memref<2x8xi32, #tpu.memory_space<smem>>) -> (i32, i32) {
    %c0_i32 = arith.constant 0 : i32
    %c0_i32_0 = arith.constant 0 : i32
    %c0_i32_1 = arith.constant 0 : i32
    return %c0_i32, %c0_i32_0 : i32, i32
  }
  func.func @transform_3(%arg0: i32, %arg1: i32, %arg2: memref<2x8xi32, #tpu.memory_space<smem>>) -> (i32, i32) {
    %c0_i32 = arith.constant 0 : i32
    %c0_i32_0 = arith.constant 0 : i32
    %c0_i32_1 = arith.constant 0 : i32
    return %c0_i32, %c0_i32_0 : i32, i32
  }
  func.func @transform_4(%arg0: i32, %arg1: i32, %arg2: memref<2x8xi32, #tpu.memory_space<smem>>) -> (i32, i32) {
    %c0_i32 = arith.constant 0 : i32
    %c0_i32_0 = arith.constant 0 : i32
    %c0_i32_1 = arith.constant 0 : i32
    return %c0_i32, %c0_i32_0 : i32, i32
  }
  func.func @transform_6(%arg0: i32, %arg1: i32, %arg2: memref<2x8xi32, #tpu.memory_space<smem>>) -> (i32, i32, i32) {
    %c0_i32 = arith.constant 0 : i32
    %c0_i32_0 = arith.constant 0 : i32
    return %arg0, %arg1, %c0_i32 : i32, i32, i32
  }
}

</mosaic_0001>

<bundles_post_ra>
// kernel: tpu_custom_call.1
= control target key start
LH: loop header
LB: loop body
LE: loop exit
PB: predicated region body
PF: predicated region fallthrough
CT: control target
= control target key end

     0   :  { %s1116_s27 = smov [#allocation5]   ;;  %s1383_s0 = inlined_call_operand.vmem [shape: s32[2,8], index: 0, kind: input, shape index: {}]   ;;  %s1384_s1 = inlined_call_operand.vmem [shape: s32[2,8,1], index: 1, kind: input, shape index: {}]   ;;  %s1385_s2 = inlined_call_operand.vmem [shape: f32[16,128], index: 2, kind: input, shape index: {}]   ;;  %s1386_s3 = inlined_call_operand.vmem [shape: f32[2,128], index: 3, kind: input, shape index: {}]   ;;  %s1387_s4 = inlined_call_operand.vmem [shape: f32[1,128], index: 4, kind: input, shape index: {}]   ;;  %s1388_s5 = inlined_call_operand.vmem [shape: f32[1,128], index: 5, kind: input, shape index: {}]   ;;  %s1389_s6 = inlined_call_operand.hbm [shape: f32[29,128], index: 6, kind: input, shape index: {}]   ;;  %s1390_s7 = inlined_call_operand.hbm [shape: f32[2,8,128], index: 7, kind: output, shape index: {}]  }
   0x1   :  { %s13_s26 = sshll.u32 %s1383_s0, 4  ;;  %s14_s26 = int_to_ptr.vmem [resolvable:$true] %s13_s26 }
   0x2   :  { %16 = dma.vmem_to_smem %s14_s26, 32, %s1116_s27, [#allocation4] }
   0x3   :  { %1070 = dma.done.wait [#allocation4], 32 }
   0x4   :  { %1071 = vsyncadd [#allocation4], 4294967264 }
   0x5   :  { %19 = sfence }
   0x6   :  { %20 = vsyncpa [#allocation7], 0 }
   0x7   :  { %22 = vsyncpa [#allocation7 + $0x1], 0  ;;  %s1170_s28 = smov 0   ;;  %s1172_s29 = smov 0  }
   0x8   :  { %s1174_s30 = smov 0   ;;  %s1176_s8 = smov 0  }
   0x9   :  { %s1178_s9 = smov 0   ;;  %s1180_s10 = smov 0  }
   0xa LB: > { %1397 = sst [smem:[#allocation36_spill]] %s1094_s28  ;;  %s713_s0 = sadd.s32 4294967295, %s1114_s10   ;;  %s1114_s10 = sphi %s1180_s10, %s28_s10   ;;  %s1110_s9 = sphi %s1178_s9, %s1411_s9   ;;  %s1106_s8 = sphi %s1176_s8, %s1410_s8   ;;  %s1102_s30 = sphi %s1174_s30, %s1409_s30   ;;  %s1098_s29 = sphi %s1172_s29, %s1413_s29   ;;  %s1094_s28 = sphi %s1170_s28, %s1412_s28  }
   0xb   : > { %1398 = sst [smem:[#allocation37_spill]] %s1102_s30  ;;  %s714_s11 = sadd.s32 4294967294, %s1114_s10  }
   0xc   : > { %1399 = sst [smem:[#allocation38_spill]] %s1110_s9  ;;  %s40_s12 = sadd.s32 1, %s1110_s9 }
   0xd   : > { %s166_s13 = sadd.s32 1, %s1102_s30  ;;  %p42_p0 = scmp.ge.s32.totalorder %s40_s12, 2 }
   0xe   : > { %p176_p1 = scmp.ne.s32.totalorder %s1102_s30, %s1098_s29  ;;  %p177_p2 = scmp.eq.s32.totalorder %s713_s0, 1 }
   0xf   : > { %p182_p3 = scmp.ne.s32.totalorder %s1098_s29, %s1094_s28  ;;  %s1415_s12 = smov (%p42_p0, %s40_s12), 0 }
  0x10   : > { %1400 = sst [smem:[#allocation39_spill]] %s1415_s12  ;;  %p1210_p4 = por %p177_p2, %p176_p1 }
  0x11   : > { %p183_p5 = scmp.eq.s32.totalorder %s714_s11, 1  ;;  %s161_s15 = ssub.s32 %s1110_s9, %s1415_s12 }
  0x12   : > { %p718_p6 = scmp.ge.s32.totalorder %s1114_s10, 1  ;;  %p164_p7 = scmp.eq.s32.totalorder %s161_s15, 0 }
  0x13   : > { %p1217_p8 = por %p183_p5, %p182_p3  ;;  %p227_p9 = scmp.lt.s32.totalorder %s1114_s10, 3 }
  0x14   : > { %s1223_s17 = scalar_select %p164_p7, %s1102_s30, %s166_s13  }
  0x15   : > { %s1402_s16 = scalar_select %p1217_p8, 1, 0 }
  0x16   : > { %1404 = sst [smem:[#allocation41_spill]] %s1223_s17  ;;  %p228_p10 = pnand %p718_p6, %p227_p9 }
  0x17   : > { %1403 = sst [smem:[#allocation40_spill]] %s1402_s16  ;;  %s1391_s18 = sand.u32 (!%p228_p10), 1, %s1098_s29  }
  0x18   : > { %231 = sbr.rel (%p228_p10) target bundleno = 548 (0x224), region = 40  ;;  %p261_p11 = scmp.lt.s32.totalorder (!%p228_p10), %s1106_s8, 1 }
  0x19   : > { %s1229_s19 = sshll.u32 (!%p228_p10), %s1391_s18, 3  ;;  %s1232_s20 = sshll.u32 (!%p228_p10), %s1106_s8, 7 }
  0x1a   : > { %s280_s21 = sld [smem:[#allocation5 + %s1232_s20]] (!%p228_p10)  ;;  %s302_s23 = sadd.s32 (!%p228_p10), 1, %s1232_s20 }
  0x1b   : > { %s1117_s25 = smov (!%p228_p10), [#allocation2]   ;;  %s303_s13 = sld [smem:[#allocation5 + %s302_s23]] (!%p228_p10) }
  0x1c   : > { %s291_s26 = sshll.u32 (!%p228_p10), %s1117_s25, 4  ;;  %s1118_s17 = smov (!%p228_p10), [#allocation2 + $0x1]   ;;  %s292_s26 = int_to_ptr.vmem [resolvable:$true] %s291_s26 }
  0x1d   : > { %s262_s22 = scalar_select %p261_p11, %s1106_s8, 1 }
  0x1e   : > { %s1245_s30 = sshll.u32 %s1118_s17, 4  ;;  %s327_s16 = sadd.s32 2, %s1232_s20  ;;  %s317_s30 = int_to_ptr.vmem [resolvable:$true] %s1245_s30 }
  0x1f   : > { %s720_s24 = sshll.u32 %s262_s22, 3 }
  0x20   : > { %s1240_s11 = scalar_lea.vmem %s1384_s1, %s720_s24  ;;  %s281_s12 = scalar_lea.hbm %s1389_s6, %s280_s21 }
  0x21   : > { %s289_s9 = sshll.u32 %s281_s12, 4  ;;  %s1251_s24 = scalar_lea.hbm %s1389_s6, 32  ;;  %s290_s9 = int_to_ptr.hbm [resolvable:$true] %s289_s9 }
  0x22   : > { %s826_s22 = sshra.s32 %s290_s9, 4  ;;  %s827_s22 = int_to_ptr.hbm [resolvable:$true] %s826_s22 }
  0x23   : > { %s828_s25 = scalar_lea.hbm %s827_s22, 1  ;;  %p831_p13 = scmp.lt.s32.totalorder %s827_s22, %s1389_s6 }
  0x24   : > { %p829_p12 = scmp.ne.s32.totalorder %s827_s22, %s828_s25  ;;  %p832_p0 = scmp.lt.s32.totalorder %s1251_s24, %s828_s25 }
  0x26   : > { %p833_p1 = por %p832_p0, %p831_p13 }
  0x28   : > { %p834_p2 = pnand %p833_p1, %p829_p12 }
  0x2a   : > { %837 = shalt.err (!%p834_p2)  }
  0x2b   : > { %294 = dma.hbm_to_vmem [thread:$0]  %s290_s9, 16, %s292_s26, [#allocation3] }
  0x2c   : > { %s328_s12 = sld [smem:[#allocation5 + %s327_s16]]  ;;  %s304_s28 = scalar_lea.hbm %s1389_s6, %s303_s13 }
  0x2d   : > { %s314_s21 = sshll.u32 %s304_s28, 4  ;;  %s1119_s15 = smov [#allocation2 + $0x2]   ;;  %s315_s21 = int_to_ptr.hbm [resolvable:$true] %s314_s21 }
  0x2e   : > { %s1261_s27 = sshll.u32 %s1119_s15, 4  ;;  %s352_s22 = sadd.s32 3, %s1232_s20  ;;  %s342_s27 = int_to_ptr.vmem [resolvable:$true] %s1261_s27 }
  0x2f   : > { %s850_s25 = sshra.s32 %s315_s21, 4  ;;  %s851_s25 = int_to_ptr.hbm [resolvable:$true] %s850_s25 }
  0x30   : > { %s852_s23 = scalar_lea.hbm %s851_s25, 1  ;;  %p855_p5 = scmp.lt.s32.totalorder %s851_s25, %s1389_s6 }
  0x31   : > { %p853_p3 = scmp.ne.s32.totalorder %s851_s25, %s852_s23  ;;  %p856_p6 = scmp.lt.s32.totalorder %s1251_s24, %s852_s23 }
  0x33   : > { %p857_p7 = por %p856_p6, %p855_p5 }
  0x35   : > { %p858_p9 = pnand %p857_p7, %p853_p3 }
  0x37   : > { %861 = shalt.err (!%p858_p9)  }
  0x38   : > { %319 = dma.hbm_to_vmem [thread:$0]  %s315_s21, 16, %s317_s30, [#allocation3 + $0x1] }
  0x39   : > { %s353_s16 = sld [smem:[#allocation5 + %s352_s22]]  ;;  %s329_s17 = scalar_lea.hbm %s1389_s6, %s328_s12 }
  0x3a   : > { %s339_s18 = sshll.u32 %s329_s17, 4  ;;  %s1120_s28 = smov [#allocation2 + $0x3]   ;;  %s340_s18 = int_to_ptr.hbm [resolvable:$true] %s339_s18 }
  0x3b   : > { %s1272_s15 = sshll.u32 %s1120_s28, 4  ;;  %s377_s25 = sadd.s32 4, %s1232_s20  ;;  %s367_s15 = int_to_ptr.vmem [resolvable:$true] %s1272_s15 }
  0x3c   : > { %s874_s23 = sshra.s32 %s340_s18, 4  ;;  %s875_s23 = int_to_ptr.hbm [resolvable:$true] %s874_s23 }
  0x3d   : > { %s876_s9 = scalar_lea.hbm %s875_s23, 1  ;;  %p879_p11 = scmp.lt.s32.totalorder %s875_s23, %s1389_s6 }
  0x3e   : > { %p877_p10 = scmp.ne.s32.totalorder %s875_s23, %s876_s9  ;;  %p880_p12 = scmp.lt.s32.totalorder %s1251_s24, %s876_s9 }
  0x40   : > { %p881_p13 = por %p880_p12, %p879_p11 }
  0x42   : > { %p882_p0 = pnand %p881_p13, %p877_p10 }
  0x44   : > { %885 = shalt.err (!%p882_p0)  }
  0x45   : > { %344 = dma.hbm_to_vmem [thread:$0]  %s340_s18, 16, %s342_s27, [#allocation3 + $0x2] }
  0x46   : > { %s378_s12 = sld [smem:[#allocation5 + %s377_s25]]  ;;  %s354_s13 = scalar_lea.hbm %s1389_s6, %s353_s16 }
  0x47   : > { %s364_s0 = sshll.u32 %s354_s13, 4  ;;  %s1121_s17 = smov [#allocation2 + $0x4]   ;;  %s365_s0 = int_to_ptr.hbm [resolvable:$true] %s364_s0 }
  0x48   : > { %s1283_s28 = sshll.u32 %s1121_s17, 4  ;;  %s402_s23 = sadd.s32 5, %s1232_s20  ;;  %s392_s28 = int_to_ptr.vmem [resolvable:$true] %s1283_s28 }
  0x49   : > { %s898_s9 = sshra.s32 %s365_s0, 4  ;;  %s899_s9 = int_to_ptr.hbm [resolvable:$true] %s898_s9 }
  0x4a   : > { %s900_s30 = scalar_lea.hbm %s899_s9, 1  ;;  %p903_p2 = scmp.lt.s32.totalorder %s899_s9, %s1389_s6 }
  0x4b   : > { %p901_p1 = scmp.ne.s32.totalorder %s899_s9, %s900_s30  ;;  %p904_p3 = scmp.lt.s32.totalorder %s1251_s24, %s900_s30 }
  0x4d   : > { %p905_p5 = por %p904_p3, %p903_p2 }
  0x4f   : > { %p906_p6 = pnand %p905_p5, %p901_p1 }
  0x51   : > { %909 = shalt.err (!%p906_p6)  }
  0x52   : > { %369 = dma.hbm_to_vmem [thread:$0]  %s365_s0, 16, %s367_s15, [#allocation3 + $0x3] }
  0x53   : > { %s403_s16 = sld [smem:[#allocation5 + %s402_s23]]  ;;  %s379_s22 = scalar_lea.hbm %s1389_s6, %s378_s12 }
  0x54   : > { %s389_s26 = sshll.u32 %s379_s22, 4  ;;  %s1122_s13 = smov [#allocation2 + $0x5]   ;;  %s390_s26 = int_to_ptr.hbm [resolvable:$true] %s389_s26 }
  0x55   : > { %s1294_s17 = sshll.u32 %s1122_s13, 4  ;;  %s427_s9 = sadd.s32 6, %s1232_s20  ;;  %s417_s17 = int_to_ptr.vmem [resolvable:$true] %s1294_s17 }
  0x56   : > { %s922_s30 = sshra.s32 %s390_s26, 4  ;;  %s923_s30 = int_to_ptr.hbm [resolvable:$true] %s922_s30 }
  0x57   : > { %s924_s27 = scalar_lea.hbm %s923_s30, 1  ;;  %p927_p9 = scmp.lt.s32.totalorder %s923_s30, %s1389_s6 }
  0x58   : > { %p925_p7 = scmp.ne.s32.totalorder %s923_s30, %s924_s27  ;;  %p928_p10 = scmp.lt.s32.totalorder %s1251_s24, %s924_s27 }
  0x5a   : > { %p929_p11 = por %p928_p10, %p927_p9 }
  0x5c   : > { %p930_p12 = pnand %p929_p11, %p925_p7 }
  0x5e   : > { %933 = shalt.err (!%p930_p12)  }
  0x5f   : > { %394 = dma.hbm_to_vmem [thread:$0]  %s390_s26, 16, %s392_s28, [#allocation3 + $0x4] }
  0x60   : > { %s428_s12 = sld [smem:[#allocation5 + %s427_s9]]  ;;  %s404_s25 = scalar_lea.hbm %s1389_s6, %s403_s16 }
  0x61   : > { %s414_s21 = sshll.u32 %s404_s25, 4  ;;  %s1123_s22 = smov [#allocation2 + $0x6]   ;;  %s415_s21 = int_to_ptr.hbm [resolvable:$true] %s414_s21 }
  0x62   : > { %s1305_s13 = sshll.u32 %s1123_s22, 4  ;;  %s452_s30 = sadd.s32 7, %s1232_s20  ;;  %s442_s13 = int_to_ptr.vmem [resolvable:$true] %s1305_s13 }
  0x63   : > { %s946_s27 = sshra.s32 %s415_s21, 4  ;;  %s947_s27 = int_to_ptr.hbm [resolvable:$true] %s946_s27 }
  0x64   : > { %s948_s15 = scalar_lea.hbm %s947_s27, 1  ;;  %p951_p0 = scmp.lt.s32.totalorder %s947_s27, %s1389_s6 }
  0x65   : > { %p949_p13 = scmp.ne.s32.totalorder %s947_s27, %s948_s15  ;;  %p952_p1 = scmp.lt.s32.totalorder %s1251_s24, %s948_s15 }
  0x67   : > { %p953_p2 = por %p952_p1, %p951_p0 }
  0x69   : > { %p954_p3 = pnand %p953_p2, %p949_p13 }
  0x6b   : > { %957 = shalt.err (!%p954_p3)  }
  0x6c   : > { %419 = dma.hbm_to_vmem [thread:$0]  %s415_s21, 16, %s417_s17, [#allocation3 + $0x5] }
  0x6d   : > { %s453_s16 = sld [smem:[#allocation5 + %s452_s30]]  ;;  %s429_s20 = scalar_lea.hbm %s1389_s6, %s428_s12 }
  0x6e   : > { %s439_s23 = sshll.u32 %s429_s20, 4  ;;  %s1124_s18 = smov [#allocation2 + $0x7]   ;;  %s440_s23 = int_to_ptr.hbm [resolvable:$true] %s439_s23 }
  0x6f   : > { %s466_s25 = sshll.u32 %s1124_s18, 4  ;;  %s970_s22 = sshra.s32 %s440_s23, 4  ;;  %s971_s22 = int_to_ptr.hbm [resolvable:$true] %s970_s22  ;;  %s467_s25 = int_to_ptr.vmem [resolvable:$true] %s466_s25 }
  0x70   : > { %s972_s27 = scalar_lea.hbm %s971_s22, 1  ;;  %p975_p6 = scmp.lt.s32.totalorder %s971_s22, %s1389_s6 }
  0x71   : > { %p973_p5 = scmp.ne.s32.totalorder %s971_s22, %s972_s27  ;;  %p976_p7 = scmp.lt.s32.totalorder %s1251_s24, %s972_s27 }
  0x73   : > { %p977_p9 = por %p976_p7, %p975_p6 }
  0x75   : > { %p978_p10 = pnand %p977_p9, %p973_p5 }
  0x77   : > { %981 = shalt.err (!%p978_p10)  }
  0x78   : > { %444 = dma.hbm_to_vmem [thread:$0]  %s440_s23, 16, %s442_s13, [#allocation3 + $0x6] }
  0x79   : > { %s454_s21 = scalar_lea.hbm %s1389_s6, %s453_s16 }
  0x7a   : > { %s464_s30 = sshll.u32 %s454_s21, 4  ;;  %s465_s30 = int_to_ptr.hbm [resolvable:$true] %s464_s30 }
  0x7b   : > { %s994_s26 = sshra.s32 %s465_s30, 4  ;;  %s995_s26 = int_to_ptr.hbm [resolvable:$true] %s994_s26 }
  0x7c   : > { %s996_s9 = scalar_lea.hbm %s995_s26, 1  ;;  %p999_p12 = scmp.lt.s32.totalorder %s995_s26, %s1389_s6 }
  0x7d   : > { %p997_p11 = scmp.ne.s32.totalorder %s995_s26, %s996_s9  ;;  %p1000_p13 = scmp.lt.s32.totalorder %s1251_s24, %s996_s9 }
  0x7f   : > { %p1001_p0 = por %p1000_p13, %p999_p12 }
  0x81   : > { %p1002_p1 = pnand %p1001_p0, %p997_p11 }
  0x83   : > { %1005 = shalt.err (!%p1002_p1)  }
  0x84   : > { %469 = dma.hbm_to_vmem [thread:$0]  %s465_s30, 16, %s467_s25, [#allocation3 + $0x7] }
  0x85   : > { %s260_s13 = scalar_lea.vmem [#allocation6], %s1229_s19 }
  0x86   : > { %1072 = dma.done.wait [#allocation3], 16 }
  0x87   : > { %1073 = vsyncadd [#allocation3], 4294967280 }
  0x88   : > { %1074 = dma.done.wait [#allocation3 + $0x1], 16 }
  0x89   : > { %1075 = vsyncadd [#allocation3 + $0x1], 4294967280 }
  0x8a   : > { %1076 = dma.done.wait [#allocation3 + $0x2], 16 }
  0x8b   : > { %1077 = vsyncadd [#allocation3 + $0x2], 4294967280 }
  0x8c   : > { %1078 = dma.done.wait [#allocation3 + $0x3], 16 }
  0x8d   : > { %1079 = vsyncadd [#allocation3 + $0x3], 4294967280 }
  0x8e   : > { %1080 = dma.done.wait [#allocation3 + $0x4], 16 }
  0x8f   : > { %1081 = vsyncadd [#allocation3 + $0x4], 4294967280 }
  0x90   : > { %1082 = dma.done.wait [#allocation3 + $0x5], 16 }
  0x91   : > { %1083 = vsyncadd [#allocation3 + $0x5], 4294967280 }
  0x92   : > { %1084 = dma.done.wait [#allocation3 + $0x6], 16 }
  0x93   : > { %1085 = vsyncadd [#allocation3 + $0x6], 4294967280 }
  0x94   : > { %1086 = dma.done.wait [#allocation3 + $0x7], 16 }
  0x95   : > { %1087 = vsyncadd [#allocation3 + $0x7], 4294967280  ;;  %v1125_v0 = vmov 0   ;;  %v490_v1 = vld [vmem:[%s1240_s11] sm:$0xff]  ;;  %v1126_v15 = vmov 128.0   ;;  %s730_s11 = sshll.u32 %s1106_s8, 3 }
  0x96   : > { %807 = vset.pattern.permute.xlu0 %v1125_v0  ;;  %vm492_vm0 = vcmp.eq.s32.totalorder %v490_v1, 0  ;;  %vm500_vm1 = vcmp.eq.s32.totalorder %v490_v1, 1  ;;  %v491_v5 = vld [vmem:[%s1386_s3] sm:$0x3]  ;;  %810 = vrcp.f32 %v1126_v15  ;;  %s559_s28 = scalar_lea.hbm %s1390_s7, %s730_s11  ;;  %s561_s8 = sshll.u32 %s260_s13, 4  ;;  %s562_s8 = int_to_ptr.vmem [resolvable:$true] %s561_s8 }
  0x97   : > { %v493_v2 = vsel %vm492_vm0, 1, %v1125_v0  ;;  %v501_v3 = vsel %vm500_vm1, 1, %v1125_v0  ;;  %v487_v6 = vld [vmem:[#allocation2] sm:$0xff]  ;;  %v498_v8 = vperm.slane %v491_v5, 0  ;;  %v506_v9 = vperm.slane %v491_v5, 1  ;;  %s563_s21 = sshll.u32 %s559_s28, 4  ;;  %s564_s21 = int_to_ptr.hbm [resolvable:$true] %s563_s21 }
  0x98   : > { %495 = vperm.xlu0 %807, %v493_v2   ;;  %v488_v7 = vld [vmem:[%s1385_s2] sm:$0xff]  ;;  %s1405_s30 = sand.u32 1, %s1098_s29   ;;  %s1032_s9 = sshra.s32 %s564_s21, 4  ;;  %s1033_s9 = int_to_ptr.hbm [resolvable:$true] %s1032_s9 }
  0x99   : > { %v489_v10 = vadd.f32 %v488_v7, %v487_v6  ;;  %v808_v35 = vld [vmem:[%s1387_s4] ss:$0 sm:$0xff]  ;;  %s548_s26 = scalar_lea.sflag [#allocation7], %s1405_s30  ;;  %s1034_s0 = scalar_lea.hbm %s1033_s9, 8 }
  0x9a   : > { %v809_v38 = vld [vmem:[%s1388_s5] ss:$0 sm:$0xff]  ;;  %p1035_p2 = scmp.ne.s32.totalorder %s1033_s9, %s1034_s0  ;;  %s1038_s16 = scalar_lea.hbm %s1390_s7, 16 }
  0x9b   : > { %p1039_p6 = scmp.lt.s32.totalorder %s1033_s9, %s1390_s7  ;;  %p1040_p7 = scmp.lt.s32.totalorder %s1038_s16, %s1034_s0 }
  0x9c   : > { %v811_v16 = vpop.eup %810  ;;  %p1036_p3 = pnand %p1035_p2, %p1210_p4 }
  0x9d   : > { %v512_v17 = vmul.f32 128.0, %v811_v16  ;;  %vm516_vm4 = vweird.f32 %v811_v16  ;;  %p1041_p9 = por %p1040_p7, %p1039_p6 }
  0x9e   : > { %p1037_p5 = pneg %p1036_p3 }
  0x9f   : > { %v513_v18 = vsub.f32 1.0, %v512_v17 }
  0xa0   : > { %503 = vperm.xlu0 %807, %v501_v3   ;;  %p1042_p10 = pnand %p1041_p9, %p1037_p5 }
  0xa1   : > { %v514_v19 = vmul.f32 %v811_v16, %v513_v18 }
  0xa3   : > { %v515_v20 = vadd.f32 %v811_v16, %v514_v19 }
  0xa5   : > { %v517_v21 = vsel %vm516_vm4, %v811_v16, %v515_v20 }
 0x10a   : > { %v496_v4 = vpop.permute.xlu0 %495 }
 0x10b   : > { %vm497_vm2 = vcmp.eq.s32.totalorder %v496_v4, 1 }
 0x10c   : > { %v499_v12 = vsel %vm497_vm2, %v498_v8, 0.0 }
 0x112   : > { %v504_v11 = vpop.permute.xlu0 %503 }
 0x113   : > { %vm505_vm3 = vcmp.eq.s32.totalorder %v504_v11, 1 }
 0x114   : > { %v507_v13 = vsel %vm505_vm3, %v506_v9, %v499_v12 }
 0x115   : > { %v508_v14 = vadd.f32 %v507_v13, %v489_v10 }
 0x117   : > { %509 = vadd.xlane.f32.xlu1 %v508_v14 }
 0x18a   : > { %v510_v22 = vpop.xlane.xlu1 %509 }
 0x18b   : > { %v518_v23 = vmul.f32 %v517_v21, %v510_v22 }
 0x18d   : > { %v519_v24 = vsub.f32 %v508_v14, %v518_v23 }
 0x18f   : > { %v520_v25 = vmul.f32 %v519_v24, %v519_v24 }
 0x191   : > { %521 = vadd.xlane.f32.xlu1 %v520_v25 }
 0x204   : > { %v522_v26 = vpop.xlane.xlu1 %521 }
 0x205   : > { %v523_v27 = vmul.f32 %v522_v26, %v517_v21 }
 0x207   : > { %v524_v28 = vadd.f32 1e-05, %v523_v27 }
 0x209   : > { %812 = vrsqrt.f32 %v524_v28  ;;  %vm531_vm6 = vweird.f32 %v524_v28 }
 0x20f   : > { %v813_v29 = vpop.eup %812 }
 0x210   : > { %v526_v30 = vmul.f32 %v813_v29, %v524_v28  ;;  %vm532_vm5 = vweird.f32 %v813_v29 }
 0x211   : > { %vm533_vm7 = vmor %vm531_vm6, %vm532_vm5 }
 0x212   : > { %v527_v31 = vmul.f32 %v813_v29, %v526_v30 }
 0x214   : > { %v528_v32 = vmul.f32 0.5, %v527_v31 }
 0x216   : > { %v529_v33 = vsub.f32 1.5, %v528_v32 }
 0x218   : > { %v530_v34 = vmul.f32 %v813_v29, %v529_v33 }
 0x21a   : > { %v534_v36 = vsel %vm533_vm7, %v813_v29, %v530_v34 }
 0x21b   : > { %v535_v37 = vmul.f32 %v534_v36, %v519_v24 }
 0x21d   : > { %v540_v39 = vmul.f32 %v808_v35, %v535_v37 }
 0x21f   : > { %v545_v40 = vadd.f32 %v809_v38, %v540_v39 }
 0x221   : > { %546 = vst [vmem:[%s260_s13] sm:$0xff] %v545_v40 }
 0x222   : > { %1045 = shalt.err (!%p1042_p10)
}
 0x223   : > { %741 = dma.vmem_to_hbm [thread:$0]  (%p1210_p4), %s562_s8, 128, %s564_s21, %s548_s26  }
 0x224 PF: > { %s1406_s19 = sld [smem:[#allocation36_spill]]  ;;  %p747_p11 = scmp.ge.s32.totalorder %s1114_s10, 2 }
 0x226   : > { %p744_p12 = pnand %p747_p11, %p1217_p8 }
 0x228   : > { %p745_p13 = pneg %p744_p12 }
 0x22a   : > { %s575_s11 = sand.u32 1, %s1406_s19  }
 0x22b   : > { %s576_s25 = scalar_lea.sflag [#allocation7], %s575_s11 }
 0x22c   : > { %1089 = dma.done.wait (%p745_p13), %s576_s25, 128  }
 0x22d   : > { %1091 = vsyncadd (%p745_p13), %s576_s25, 4294967168  ;;  %s28_s10 = sadd.s32 1, %s1114_s10   ;;  %s1408_s22 = sld [smem:[#allocation37_spill]] }
 0x22e   : > { %p25_p0 = scmp.ge.s32.totalorder %s28_s10, 4   ;;  %s1409_s30 = sld [smem:[#allocation41_spill]] }
 0x22f   : > { %s1410_s8 = sld [smem:[#allocation38_spill]]  ;;  %s1412_s28 = smov %s1098_s29 }
 0x230   : > { %s1411_s9 = sld [smem:[#allocation39_spill]]  ;;  %27 = sbr.rel (!%p25_p0) target bundleno = 10 (0xa), region = 139 }
 0x233   : > { %s1413_s29 = smov %s1408_s22 }
 0x235   :  { %582 = vsyncpa [#allocation7], 1 }
 0x236   :  { %584 = vsyncpa [#allocation7 + $0x1], 1 }
 0x237   :  { %585 = vsyncmov [#allocation3] }
 0x23a   :  { %s586_s14 = vpop.sfrf %585 }
 0x23b   :  { %p733_p4 = scmp.ne.s32.totalorder %s586_s14, 0 }
 0x23d   :  { %590 = shalt.err (%p733_p4)  }
 0x23e   :  { %592 = vsyncmov [#allocation3 + $0x1] }
 0x241   :  { %s593_s27 = vpop.sfrf %592 }
 0x242   :  { %p734_p8 = scmp.ne.s32.totalorder %s593_s27, 0 }
 0x244   :  { %597 = shalt.err (%p734_p8)  }
 0x245   :  { %599 = vsyncmov [#allocation3 + $0x2] }
 0x248   :  { %s600_s15 = vpop.sfrf %599 }
 0x249   :  { %p735_p1 = scmp.ne.s32.totalorder %s600_s15, 0 }
 0x24b   :  { %604 = shalt.err (%p735_p1)  }
 0x24c   :  { %606 = vsyncmov [#allocation3 + $0x3] }
 0x24f   :  { %s607_s17 = vpop.sfrf %606 }
 0x250   :  { %p736_p2 = scmp.ne.s32.totalorder %s607_s17, 0 }
 0x252   :  { %611 = shalt.err (%p736_p2)  }
 0x253   :  { %613 = vsyncmov [#allocation3 + $0x4] }
 0x256   :  { %s614_s10 = vpop.sfrf %613 }
 0x257   :  { %p737_p3 = scmp.ne.s32.totalorder %s614_s10, 0 }
 0x259   :  { %618 = shalt.err (%p737_p3)  }
 0x25a   :  { %620 = vsyncmov [#allocation3 + $0x5] }
 0x25d   :  { %s621_s1 = vpop.sfrf %620 }
 0x25e   :  { %p738_p5 = scmp.ne.s32.totalorder %s621_s1, 0 }
 0x260   :  { %625 = shalt.err (%p738_p5)  }
 0x261   :  { %627 = vsyncmov [#allocation3 + $0x6] }
 0x264   :  { %s628_s2 = vpop.sfrf %627 }
 0x265   :  { %p739_p6 = scmp.ne.s32.totalorder %s628_s2, 0 }
 0x267   :  { %632 = shalt.err (%p739_p6)  }
 0x268   :  { %634 = vsyncmov [#allocation3 + $0x7] }
 0x26b   :  { %s635_s3 = vpop.sfrf %634 }
 0x26c   :  { %p740_p7 = scmp.ne.s32.totalorder %s635_s3, 0 }
 0x26e   :  { %639 = shalt.err (%p740_p7)  }

</bundles_post_ra>
